<compile_context>
chip_gen: v7x
topology: tpu7x:2x2x1
jax: 0.10.0
libtpu: 0.0.40
codegen_flags: <defaults>
</compile_context>

<pallas_src>
import numpy as np
import jax
import jax.numpy as jnp
from jax.experimental import pallas as pl
from jax.experimental.pallas import tpu as pltpu

# ---- MelSpectrogram configuration (torchaudio defaults, small synthetic sizes) ----
SAMPLE_RATE = 16000
N_FFT = 128
WIN_LENGTH = 128          # torchaudio default: win_length == n_fft
HOP_LENGTH = 64           # torchaudio default: win_length // 2
N_MELS = 16
F_MIN = 0.0
F_MAX = SAMPLE_RATE / 2.0
LOG_EPS = 0.001           # from MelSpectrogramFixed.forward
N_FREQ = N_FFT // 2 + 1   # 65 onesided STFT bins
PAD_FREQ = 128            # frequency axis zero-padded to one full vreg of lanes
PAD_MELS = 128            # mel axis zero-padded so the in-kernel transpose is tile-aligned

assert WIN_LENGTH == N_FFT, "kernel assumes win_length == n_fft (torchaudio default)"
assert HOP_LENGTH * 2 == N_FFT, "framing assumes hop == n_fft // 2"


def _cdiv(a, b):
    return -(-a // b)


def _round_up(a, b):
    return _cdiv(a, b) * b


# ------------------------- deterministic parameter setup -------------------------
def _hz_to_mel(f):
    return 2595.0 * np.log10(1.0 + f / 700.0)


def _mel_to_hz(m):
    return 700.0 * (10.0 ** (m / 2595.0) - 1.0)


def melscale_fbanks(n_freqs, f_min, f_max, n_mels, sample_rate):
    """torchaudio.functional.melscale_fbanks, mel_scale='htk', norm=None."""
    all_freqs = np.linspace(0.0, sample_rate / 2.0, n_freqs)
    m_pts = np.linspace(_hz_to_mel(f_min), _hz_to_mel(f_max), n_mels + 2)
    f_pts = _mel_to_hz(m_pts)
    f_diff = f_pts[1:] - f_pts[:-1]                    # (n_mels + 1,)
    slopes = f_pts[None, :] - all_freqs[:, None]       # (n_freqs, n_mels + 2)
    down = -slopes[:, :-2] / f_diff[:-1]
    up = slopes[:, 2:] / f_diff[1:]
    fb = np.maximum(0.0, np.minimum(down, up))
    return fb.astype(np.float32)                       # (n_freqs, n_mels)


def build_dft_matrix():
    """Fused Hann-windowed real-DFT basis [cos | sin], freq axis padded 65 -> 128.

    frames @ M -> columns [0:128] give Re-like, [128:256] give (-Im); only
    Re^2 + Im^2 is used so the sign convention is irrelevant."""
    n = np.arange(WIN_LENGTH)
    win = 0.5 * (1.0 - np.cos(2.0 * np.pi * n / WIN_LENGTH))   # periodic Hann
    k = np.arange(N_FREQ)
    t = np.arange(N_FFT)
    ang = 2.0 * np.pi * np.outer(t, k) / N_FFT                 # (n_fft, n_freq)
    m = np.zeros((N_FFT, 2 * PAD_FREQ), dtype=np.float32)
    m[:, :N_FREQ] = win[:, None] * np.cos(ang)
    m[:, PAD_FREQ:PAD_FREQ + N_FREQ] = win[:, None] * np.sin(ang)
    return m


def build_fbank_matrix():
    """Mel filter bank with K padded 65 -> 128 and the mel axis padded 16 -> 128."""
    fb = melscale_fbanks(N_FREQ, F_MIN, F_MAX, N_MELS, SAMPLE_RATE)
    out = np.zeros((PAD_FREQ, PAD_MELS), dtype=np.float32)
    out[:N_FREQ, :N_MELS] = fb
    return out


# --------------------------------- Pallas kernel ---------------------------------
def mel_kernel(frames_ref, dft_ref, fb_ref, out_ref):
    frames = frames_ref[...]                                   # (ft, n_fft) lane-dense
    # fused windowed real-DFT: one K=128 / N=256 matmul against a small stationary weight
    y = jnp.dot(frames, dft_ref[...], preferred_element_type=jnp.float32)   # (ft, 256)
    re = y[:, :PAD_FREQ]                    # slice at the 128-lane vreg boundary (free)
    im = y[:, PAD_FREQ:]
    power = re * re + im * im               # |STFT|^2 (power=2.0); padded bins are 0
    mel = jnp.dot(power, fb_ref[...], preferred_element_type=jnp.float32)   # (ft, 128)
    # tile-aligned XLU transpose (both dims multiples of 128); rides the idle XLU slot
    mel_t = mel.T                                              # (128, ft)
    # log AFTER the transpose on dense (16, ft) vregs; lane-dense 128-lane stores
    out_ref[...] = jnp.log(mel_t[:N_MELS, :] + LOG_EPS)        # (N_MELS, ft)


def _num_tensorcores():
    """Best-effort TensorCores-per-chip (2 on v7x, else 1); only used for B == 1 tiling."""
    try:
        info = pltpu.get_tpu_info()
    except Exception:
        return 1
    for attr in ("num_cores", "num_tensorcores", "tensorcore_count", "cores_per_chip"):
        v = getattr(info, attr, None)
        if isinstance(v, int) and 0 < v <= 8:
            return v
    return 1


def _choose_frame_tile(n_frames, batch, max_tile=2048, num_tensorcores=1):
    """Frames per grid step: multiples of 128 (lane-dense transposed output), as big as
    fits comfortably in VMEM; only halve for B == 1 when the chip has 2 TensorCores."""
    t = min(max_tile, _round_up(n_frames, 128))
    if batch == 1 and num_tensorcores >= 2 and t > 128:
        t = min(t, max(128, _round_up(_cdiv(n_frames, 2), 128)))
    return max(128, t)


def mel_spectrogram_fixed(x):
    """x: (B, T) float32 waveform -> (B, n_mels, n_frames - 1) log-mel spectrogram."""
    B, T = x.shape
    assert T % HOP_LENGTH == 0, "T must be a multiple of hop_length"
    pad = N_FFT // 2
    # torch.stft(center=True, pad_mode="reflect")
    xp = jnp.pad(x, ((0, 0), (pad, pad)), mode="reflect")      # (B, T + n_fft)
    n_frames = 1 + T // HOP_LENGTH

    ft = _choose_frame_tile(n_frames, B, num_tensorcores=_num_tensorcores())
    nb = _cdiv(n_frames, ft)
    F = nb * ft
    n_chunks = F + 1
    xp = jnp.pad(xp, ((0, 0), (0, n_chunks * HOP_LENGTH - xp.shape[1])))
    xc = xp.reshape(B, n_chunks, HOP_LENGTH)
    # lane-dense frames: frame f = [chunk_f ; chunk_{f+1}]  (hop == n_fft // 2)
    frames = jnp.concatenate([xc[:, :F, :], xc[:, 1:F + 1, :]], axis=-1)  # (B, F, n_fft)

    dft = jnp.asarray(build_dft_matrix())    # (n_fft, 2 * PAD_FREQ) = (128, 256)
    fb = jnp.asarray(build_fbank_matrix())   # (PAD_FREQ, PAD_MELS)  = (128, 128)

    out = pl.pallas_call(
        mel_kernel,
        out_shape=jax.ShapeDtypeStruct((B, N_MELS, F), jnp.float32),
        grid_spec=pltpu.PrefetchScalarGridSpec(
            num_scalar_prefetch=0,
            grid=(B, nb),
            in_specs=[
                pl.BlockSpec((None, ft, N_FFT), lambda b, j: (b, j, 0)),
                pl.BlockSpec((N_FFT, 2 * PAD_FREQ), lambda b, j: (0, 0)),
                pl.BlockSpec((PAD_FREQ, PAD_MELS), lambda b, j: (0, 0)),
            ],
            # transposed, lane-dense output blocks: no epilogue transpose needed
            out_specs=pl.BlockSpec((None, N_MELS, ft), lambda b, j: (b, 0, j)),
        ),
        compiler_params=pltpu.CompilerParams(
            dimension_semantics=("parallel", "parallel"),
            vmem_limit_bytes=32 * 1024 * 1024,   # headroom for ft=2048 double buffers
        ),
    )(frames, dft, fb)

    # valid frames only; drop last frame (torch outputs[..., :-1])
    return out[:, :, : n_frames - 1]


# ------------------------------ pure-JAX reference -------------------------------
def _reference(x):
    B, T = x.shape
    pad = N_FFT // 2
    xp = jnp.pad(x, ((0, 0), (pad, pad)), mode="reflect")
    n_frames = 1 + T // HOP_LENGTH
    idx = jnp.arange(n_frames)[:, None] * HOP_LENGTH + jnp.arange(N_FFT)[None, :]
    frames = xp[:, idx]                                        # (B, n_frames, n_fft)
    n = np.arange(WIN_LENGTH)
    win = 0.5 * (1.0 - np.cos(2.0 * np.pi * n / WIN_LENGTH))
    k = np.arange(N_FREQ)
    t = np.arange(N_FFT)
    ang = 2.0 * np.pi * np.outer(t, k) / N_FFT
    cos_m = jnp.asarray((win[:, None] * np.cos(ang)).astype(np.float32))
    sin_m = jnp.asarray((win[:, None] * np.sin(ang)).astype(np.float32))
    re = jnp.einsum("bfn,nk->bfk", frames, cos_m)
    im = jnp.einsum("bfn,nk->bfk", frames, sin_m)
    power = re * re + im * im
    fb = jnp.asarray(melscale_fbanks(N_FREQ, F_MIN, F_MAX, N_MELS, SAMPLE_RATE))
    mel = jnp.einsum("bfk,km->bfm", power, fb)
    out = jnp.log(mel + LOG_EPS)
    return jnp.transpose(out, (0, 2, 1))[..., :-1]


if __name__ == "__main__":
    key = jax.random.PRNGKey(0)
    B, T = 2, 1024
    x = jax.random.normal(key, (B, T), dtype=jnp.float32)

    y = jax.jit(mel_spectrogram_fixed)(x)
    jax.block_until_ready(y)

    n_frames = 1 + T // HOP_LENGTH
    assert y.shape == (B, N_MELS, n_frames - 1), y.shape
    assert y.dtype == jnp.float32
    assert bool(jnp.all(jnp.isfinite(y)))

    ref = _reference(x)
    max_err = float(jnp.max(jnp.abs(y - ref)))
    assert bool(jnp.allclose(y, ref, atol=5e-3, rtol=5e-3)), max_err

    print("KERNEL_OK")
</pallas_src>

<mosaic_0001>
module attributes {stable_mosaic.version = 11 : i64} {
  func.func @mel_kernel(%arg0: i32, %arg1: i32, %arg2: memref<1x128x128xf32, #tpu.memory_space<vmem>>, %arg3: memref<128x256xf32, #tpu.memory_space<vmem>>, %arg4: memref<128x128xf32, #tpu.memory_space<vmem>>, %arg5: memref<1x16x128xf32, #tpu.memory_space<vmem>>) attributes {dimension_semantics = [#tpu.dimension_semantics<parallel>, #tpu.dimension_semantics<parallel>], iteration_bounds = array<i64: 2, 1>, scalar_prefetch = 0 : i64, scratch_operands = 0 : i64, tpu.core_type = #tpu.core_type<tc>, window_params = [{transform_indices = @transform_0, window_bounds = array<i64: 1, 128, 128>}, {pipeline_mode = #tpu.pipeline_mode<synchronous>, transform_indices = @transform_1, window_bounds = array<i64: 128, 256>}, {pipeline_mode = #tpu.pipeline_mode<synchronous>, transform_indices = @transform_2, window_bounds = array<i64: 128, 128>}, {transform_indices = @transform_3, window_bounds = array<i64: 1, 16, 128>}]} {
    %c0 = arith.constant 0 : index
    %c0_0 = arith.constant 0 : index
    %c0_1 = arith.constant 0 : index
    %0 = vector.load %arg2[%c0, %c0_0, %c0_1] : memref<1x128x128xf32, #tpu.memory_space<vmem>>, vector<1x128x128xf32>
    %1 = vector.shape_cast %0 : vector<1x128x128xf32> to vector<128x128xf32>
    %c0_2 = arith.constant 0 : index
    %c0_3 = arith.constant 0 : index
    %2 = vector.load %arg3[%c0_2, %c0_3] : memref<128x256xf32, #tpu.memory_space<vmem>>, vector<128x256xf32>
    %cst = arith.constant dense<0.000000e+00> : vector<128x256xf32>
    %3 = tpu.matmul %1, %2, %cst {dimension_numbers = #tpu.dot_dimension_numbers<[1], [0], [0], [1], [0, 0, 1, 1], [], []>} : vector<128x128xf32>, vector<128x256xf32>, vector<128x256xf32> -> vector<128x256xf32>
    %4 = vector.extract_strided_slice %3 {offsets = [0, 0], sizes = [128, 128], strides = [1, 1]} : vector<128x256xf32> to vector<128x128xf32>
    %5 = vector.extract_strided_slice %3 {offsets = [0, 128], sizes = [128, 128], strides = [1, 1]} : vector<128x256xf32> to vector<128x128xf32>
    %6 = arith.mulf %4, %4 : vector<128x128xf32>
    %7 = arith.mulf %5, %5 : vector<128x128xf32>
    %8 = arith.addf %6, %7 : vector<128x128xf32>
    %c0_4 = arith.constant 0 : index
    %c0_5 = arith.constant 0 : index
    %9 = vector.load %arg4[%c0_4, %c0_5] : memref<128x128xf32, #tpu.memory_space<vmem>>, vector<128x128xf32>
    %cst_6 = arith.constant dense<0.000000e+00> : vector<128x128xf32>
    %10 = tpu.matmul %8, %9, %cst_6 {dimension_numbers = #tpu.dot_dimension_numbers<[1], [0], [0], [1], [0, 0, 1, 1], [], []>} : vector<128x128xf32>, vector<128x128xf32>, vector<128x128xf32> -> vector<128x128xf32>
    %11 = tpu.transpose %10, [1, 0] : vector<128x128xf32> -> vector<128x128xf32>
    %12 = vector.extract_strided_slice %11 {offsets = [0, 0], sizes = [16, 128], strides = [1, 1]} : vector<128x128xf32> to vector<16x128xf32>
    %cst_7 = arith.constant 1.000000e-03 : f32
    %13 = vector.broadcast %cst_7 : f32 to vector<16x128xf32>
    %14 = arith.addf %12, %13 : vector<16x128xf32>
    %15 = math.log %14 : vector<16x128xf32>
    %c0_8 = arith.constant 0 : index
    %c0_9 = arith.constant 0 : index
    %c0_10 = arith.constant 0 : index
    %16 = vector.load %arg5[%c0_8, %c0_9, %c0_10] : memref<1x16x128xf32, #tpu.memory_space<vmem>>, vector<1x16x128xf32>
    %17 = vector.shape_cast %16 : vector<1x16x128xf32> to vector<16x128xf32>
    %18 = vector.shape_cast %15 : vector<16x128xf32> to vector<1x16x128xf32>
    tpu.vector_store %arg5[%c0_8, %c0_9, %c0_10], %18 {strides = array<i32>} : memref<1x16x128xf32, #tpu.memory_space<vmem>>, vector<1x16x128xf32>,
    return
  }
  func.func @transform_0(%arg0: i32, %arg1: i32) -> (i32, i32, i32) {
    %c0_i32 = arith.constant 0 : i32
    %c0_i32_0 = arith.constant 0 : i32
    return %arg0, %arg1, %c0_i32 : i32, i32, i32
  }
  func.func @transform_1(%arg0: i32, %arg1: i32) -> (i32, i32) {
    %c0_i32 = arith.constant 0 : i32
    %c0_i32_0 = arith.constant 0 : i32
    %c0_i32_1 = arith.constant 0 : i32
    return %c0_i32, %c0_i32_0 : i32, i32
  }
  func.func @transform_2(%arg0: i32, %arg1: i32) -> (i32, i32) {
    %c0_i32 = arith.constant 0 : i32
    %c0_i32_0 = arith.constant 0 : i32
    %c0_i32_1 = arith.constant 0 : i32
    return %c0_i32, %c0_i32_0 : i32, i32
  }
  func.func @transform_3(%arg0: i32, %arg1: i32) -> (i32, i32, i32) {
    %c0_i32 = arith.constant 0 : i32
    %c0_i32_0 = arith.constant 0 : i32
    return %arg0, %c0_i32, %arg1 : i32, i32, i32
  }
}

</mosaic_0001>

<bundles_post_ra>
// kernel: mel_spectrogram_fixed.1
= control target key start
LH: loop header
LB: loop body
LE: loop exit
PB: predicated region body
PF: predicated region fallthrough
CT: control target
= control target key end

     0   :  { %8 = vsyncpa [#allocation3], 0  ;;  %s1378_s0 = inlined_call_operand.vmem [shape: f32[2,128,128], index: 0, kind: input, shape index: {}]   ;;  %s1379_s1 = inlined_call_operand.vmem [shape: f32[128,256], index: 1, kind: input, shape index: {}]   ;;  %s1380_s2 = inlined_call_operand.vmem [shape: f32[128,128], index: 2, kind: input, shape index: {}]   ;;  %s1381_s3 = inlined_call_operand.hbm [shape: f32[2,16,128], index: 3, kind: output, shape index: {}]  }
   0x1   :  { %10 = vsyncpa [#allocation3 + $0x1], 0  ;;  %s1083_s12 = smov 0   ;;  %s1085_s13 = smov 0  }
   0x2   :  { %s1087_s14 = smov 0   ;;  %s1089_s15 = smov 0  }
   0x3   :  { %s1091_s16 = smov 0   ;;  %s1093_s17 = smov 0  }
   0x4 LB: > { %s750_s18 = sadd.s32 4294967295, %s1057_s17   ;;  %s751_s19 = sadd.s32 4294967294, %s1057_s17   ;;  %s1057_s17 = sphi %s1093_s17, %s16_s17   ;;  %s1053_s16 = sphi %s1091_s16, %s1388_s16   ;;  %s1049_s15 = sphi %s1089_s15, %s1387_s15   ;;  %s1045_s14 = sphi %s1087_s14, %s1386_s14   ;;  %s1041_s13 = sphi %s1085_s13, %s1385_s13   ;;  %s1037_s12 = sphi %s1083_s12, %s1384_s12  }
   0x5   : > { %s28_s20 = sadd.s32 1, %s1053_s16  ;;  %s107_s21 = sadd.s32 1, %s1045_s14 }
   0x6   : > { %p30_p0 = scmp.ge.s32.totalorder %s28_s20, 2  ;;  %p117_p1 = scmp.ne.s32.totalorder %s1045_s14, %s1041_s13 }
   0x7   : > { %p118_p2 = scmp.eq.s32.totalorder %s750_s18, 1  ;;  %p123_p3 = scmp.ne.s32.totalorder %s1041_s13, %s1037_s12 }
   0x8   : > { %s1390_s20 = smov (%p30_p0, %s28_s20), 0  ;;  %p124_p5 = scmp.eq.s32.totalorder %s751_s19, 1 }
   0x9   : > { %p1123_p4 = por %p118_p2, %p117_p1  ;;  %s102_s23 = ssub.s32 %s1053_s16, %s1390_s20 }
   0xa   : > { %p754_p6 = scmp.ge.s32.totalorder %s1057_s17, 1  ;;  %p105_p7 = scmp.eq.s32.totalorder %s102_s23, 0 }
   0xb   : > { %p1130_p8 = por %p124_p5, %p123_p3  ;;  %p161_p9 = scmp.lt.s32.totalorder %s1057_s17, 3 }
   0xc   : > { %s1136_s25 = scalar_select %p105_p7, %s1045_s14, %s107_s21  }
   0xd   : > { %p162_p10 = pnand %p754_p6, %p161_p9 }
   0xe   : > { %v216_v0 = vld [vmem:[%s1379_s1 + $0x8] sm:$0xff] (!%p162_p10)  ;;  %v218_v1 = vld [vmem:[%s1379_s1 + $0x18] sm:$0xff] (!%p162_p10)  ;;  %v215_v2 = vld [vmem:[%s1379_s1] sm:$0xff] (!%p162_p10)  ;;  %v1059_v7 = vmov (!%p162_p10), 0.0   ;;  %p190_p11 = scmp.lt.s32.totalorder (!%p162_p10), %s1049_s15, 1  ;;  %s186_s23 = sand.u32 (!%p162_p10), 1, %s1041_s13  }
   0xf   : > { %165 = sbr.rel (%p162_p10) target bundleno = 646 (0x286), region = 32  ;;  %v853_v3 = vpack.c.bf16 (!%p162_p10), %v218_v1, %v216_v0  ;;  %v217_v4 = vld [vmem:[%s1379_s1 + $0x10] sm:$0xff] (!%p162_p10)  ;;  %v220_v5 = vld [vmem:[%s1379_s1 + $0x28] sm:$0xff] (!%p162_p10)  ;;  %v222_v6 = vld [vmem:[%s1379_s1 + $0x38] sm:$0xff] (!%p162_p10)  ;;  %311 = vmatprep.mubr.f32.mxu0 (!%p162_p10), %v1059_v7  ;;  %s755_s26 = sshll.u32 (!%p162_p10), %s186_s23, 4 }
  0x10   : > { %v855_v8 = vpack.c.bf16 (!%p162_p10), %v217_v4, %v215_v2  ;;  %v857_v9 = vpack.c.bf16 (!%p162_p10), %v222_v6, %v220_v5  ;;  %v219_v10 = vld [vmem:[%s1379_s1 + $0x20] sm:$0xff] (!%p162_p10)  ;;  %v221_v11 = vld [vmem:[%s1379_s1 + $0x30] sm:$0xff] (!%p162_p10)  ;;  %v224_v12 = vld [vmem:[%s1379_s1 + $0x48] sm:$0xff] (!%p162_p10)  ;;  %s188_s27 = scalar_lea.vmem (!%p162_p10), [#allocation2], %s755_s26  ;;  %s1332_s6 = scalar_lea.sflag (!%p162_p10), [#allocation3], %s186_s23 }
  0x11   : > { %854 = vmatprep.subr.bf16.mxu0 (!%p162_p10), %v853_v3  ;;  %v226_v13 = vld [vmem:[%s1379_s1 + $0x58] sm:$0xff] (!%p162_p10)  ;;  %v859_v14 = vpack.c.bf16 (!%p162_p10), %v221_v11, %v219_v10  ;;  %v223_v16 = vld [vmem:[%s1379_s1 + $0x40] sm:$0xff] (!%p162_p10)  ;;  %v225_v17 = vld [vmem:[%s1379_s1 + $0x50] sm:$0xff] (!%p162_p10)  ;;  %s672_s28 = sshll.u32 (!%p162_p10), %s188_s27, 4  ;;  %s1325_s28 = int_to_ptr.vmem [resolvable:$true] %s672_s28 }
  0x12   : > { %856 = vmatpush1.bf16.msra.mxu0 (!%p162_p10), %v855_v8  ;;  %v861_v15 = vpack.c.bf16 (!%p162_p10), %v226_v13, %v224_v12  ;;  %v228_v18 = vld [vmem:[%s1379_s1 + $0x68] sm:$0xff] (!%p162_p10)  ;;  %v230_v19 = vld [vmem:[%s1379_s1 + $0x78] sm:$0xff] (!%p162_p10)  ;;  %v863_v20 = vpack.c.bf16 (!%p162_p10), %v225_v17, %v223_v16  ;;  %v227_v22 = vld [vmem:[%s1379_s1 + $0x60] sm:$0xff] (!%p162_p10)  ;;  %s979_s7 = scalar_lea.vmem (!%p162_p10), %s1325_s28, 256 }
  0x13   : > { %858 = vmatprep.subr.bf16.mxu0 (!%p162_p10), %v857_v9  ;;  %v865_v21 = vpack.c.bf16 (!%p162_p10), %v230_v19, %v228_v18  ;;  %v229_v23 = vld [vmem:[%s1379_s1 + $0x70] sm:$0xff] (!%p162_p10)  ;;  %v232_v24 = vld [vmem:[%s1379_s1 + $0x88] sm:$0xff] (!%p162_p10)  ;;  %v234_v25 = vld [vmem:[%s1379_s1 + $0x98] sm:$0xff] (!%p162_p10)  ;;  %p980_p12 = scmp.ne.s32.totalorder (!%p162_p10), %s1325_s28, %s979_s7 }
  0x14   : > { %v867_v26 = vpack.c.bf16 (!%p162_p10), %v229_v23, %v227_v22  ;;  %v869_v27 = vpack.c.bf16 (!%p162_p10), %v234_v25, %v232_v24  ;;  %v231_v28 = vld [vmem:[%s1379_s1 + $0x80] sm:$0xff] (!%p162_p10)  ;;  %v233_v29 = vld [vmem:[%s1379_s1 + $0x90] sm:$0xff] (!%p162_p10)  ;;  %v236_v30 = vld [vmem:[%s1379_s1 + $0xa8] sm:$0xff] (!%p162_p10) }
  0x15   : > { %v238_v31 = vld [vmem:[%s1379_s1 + $0xb8] sm:$0xff] (!%p162_p10)  ;;  %v235_v32 = vld [vmem:[%s1379_s1 + $0xa0] sm:$0xff] (!%p162_p10)  ;;  %v871_v33 = vpack.c.bf16 (!%p162_p10), %v233_v29, %v231_v28  ;;  %v457_v35 = vld [vmem:[%s1380_s2 + $0x8] sm:$0xff] (!%p162_p10)  ;;  %p981_p13 = pnand (!%p162_p10), %p980_p12, %p1123_p4 }
  0x16   : > { %860 = vmatpush1.bf16.msra.mxu0 %v859_v14  ;;  %v456_v34 = vld [vmem:[%s1380_s2] sm:$0xff]  ;;  %v458_v36 = vld [vmem:[%s1380_s2 + $0x10] sm:$0xff]  ;;  %v873_v37 = vpack.c.bf16 %v238_v31, %v236_v30  ;;  %v240_v39 = vld [vmem:[%s1379_s1 + $0xc8] sm:$0xff]  ;;  %s191_s30 = scalar_select %p190_p11, %s1049_s15, 1 }
  0x17   : > { %862 = vmatprep.subr.bf16.mxu0 %v861_v15  ;;  %v237_v38 = vld [vmem:[%s1379_s1 + $0xb0] sm:$0xff]  ;;  %v885_v40 = vpack.c.bf16 %v457_v35, %v456_v34  ;;  %v459_v41 = vld [vmem:[%s1380_s2 + $0x18] sm:$0xff]  ;;  %v460_v44 = vld [vmem:[%s1380_s2 + $0x20] sm:$0xff]  ;;  %p982_p0 = pneg %p981_p13 }
  0x18   : > { %v242_v42 = vld [vmem:[%s1379_s1 + $0xd8] sm:$0xff]  ;;  %v889_v43 = vpack.c.bf16 %v459_v41, %v458_v36  ;;  %v461_v45 = vld [vmem:[%s1380_s2 + $0x28] sm:$0xff]  ;;  %v875_v46 = vpack.c.bf16 %v237_v38, %v235_v32  ;;  %v239_v48 = vld [vmem:[%s1379_s1 + $0xc0] sm:$0xff]  ;;  %s763_s18 = sshll.u32 %s191_s30, 7 }
  0x19   : > { %886 = vmatprep.subr.bf16.mxu1 %v885_v40  ;;  %v877_v47 = vpack.c.bf16 %v242_v42, %v240_v39  ;;  %v241_v49 = vld [vmem:[%s1379_s1 + $0xd0] sm:$0xff]  ;;  %v244_v50 = vld [vmem:[%s1379_s1 + $0xe8] sm:$0xff]  ;;  %v893_v51 = vpack.c.bf16 %v461_v45, %v460_v44  ;;  %v246_v52 = vld [vmem:[%s1379_s1 + $0xf8] sm:$0xff]  ;;  %s1272_s29 = scalar_lea.vmem %s1378_s0, %s763_s18 }
  0x1a   : > { %864 = vmatpush1.bf16.msra.mxu0 %v863_v20  ;;  %888 = vmatpush3.bf16.msra.mxu1 %v885_v40  ;;  %v462_v53 = vld [vmem:[%s1380_s2 + $0x30] sm:$0xff]  ;;  %v463_v54 = vld [vmem:[%s1380_s2 + $0x38] sm:$0xff]  ;;  %v879_v55 = vpack.c.bf16 %v241_v49, %v239_v48  ;;  %v881_v56 = vpack.c.bf16 %v246_v52, %v244_v50  ;;  %v243_v57 = vld [vmem:[%s1379_s1 + $0xe0] sm:$0xff] }
  0x1b   : > { %866 = vmatprep.subr.bf16.mxu0 %v865_v21  ;;  %890 = vmatprep.subr.bf16.mxu1 %v889_v43  ;;  %v245_v58 = vld [vmem:[%s1379_s1 + $0xf0] sm:$0xff]  ;;  %v897_v59 = vpack.c.bf16 %v463_v54, %v462_v53  ;;  %v464_v60 = vld [vmem:[%s1380_s2 + $0x40] sm:$0xff]  ;;  %v465_v61 = vld [vmem:[%s1380_s2 + $0x48] sm:$0xff] }
  0x1c   : > { %v883_v62 = vpack.c.bf16 %v245_v58, %v243_v57  ;;  %v901_v63 = vpack.c.bf16 %v465_v61, %v464_v60  ;;  %v466_v0 = vld [vmem:[%s1380_s2 + $0x50] sm:$0xff]  ;;  %v467_v1 = vld [vmem:[%s1380_s2 + $0x58] sm:$0xff]  ;;  %v199_v2 = vld [vmem:[%s1272_s29] sm:$0xff] }
  0x1d   : > { %v905_v3 = vpack.c.bf16 %v467_v1, %v466_v0  ;;  %v200_v4 = vld [vmem:[%s1272_s29 + $0x8] sm:$0xff]  ;;  %v201_v5 = vld [vmem:[%s1272_s29 + $0x10] sm:$0xff]  ;;  %v202_v6 = vld [vmem:[%s1272_s29 + $0x18] sm:$0xff] }
  0x1e   : > { %868 = vmatpush1.bf16.msra.mxu0 %v867_v26  ;;  %892 = vmatpush3.bf16.msra.mxu1 %v889_v43  ;;  %v203_v8 = vld [vmem:[%s1272_s29 + $0x20] sm:$0xff]  ;;  %v204_v9 = vld [vmem:[%s1272_s29 + $0x28] sm:$0xff]  ;;  %v205_v10 = vld [vmem:[%s1272_s29 + $0x30] sm:$0xff] }
  0x1f   : > { %870 = vmatprep.subr.bf16.mxu0 %v869_v27  ;;  %894 = vmatprep.subr.bf16.mxu1 %v893_v51  ;;  %v206_v11 = vld [vmem:[%s1272_s29 + $0x38] sm:$0xff]  ;;  %v207_v12 = vld [vmem:[%s1272_s29 + $0x40] sm:$0xff]  ;;  %v208_v13 = vld [vmem:[%s1272_s29 + $0x48] sm:$0xff] }
  0x20   : > { %v209_v14 = vld [vmem:[%s1272_s29 + $0x50] sm:$0xff]  ;;  %v210_v15 = vld [vmem:[%s1272_s29 + $0x58] sm:$0xff]  ;;  %v211_v16 = vld [vmem:[%s1272_s29 + $0x60] sm:$0xff] }
  0x21   : > { %v212_v17 = vld [vmem:[%s1272_s29 + $0x68] sm:$0xff]  ;;  %v213_v18 = vld [vmem:[%s1272_s29 + $0x70] sm:$0xff]  ;;  %v214_v19 = vld [vmem:[%s1272_s29 + $0x78] sm:$0xff]  ;;  %s764_s29 = sshll.u32 %s1049_s15, 8  ;;  %s1060_s15 = smov [#allocation2]  }
  0x22   : > { %872 = vmatpush1.bf16.msra.mxu0 %v871_v33  ;;  %896 = vmatpush3.bf16.msra.mxu1 %v893_v51  ;;  %v468_v20 = vld [vmem:[%s1380_s2 + $0x60] sm:$0xff]  ;;  %v469_v21 = vld [vmem:[%s1380_s2 + $0x68] sm:$0xff]  ;;  %v470_v23 = vld [vmem:[%s1380_s2 + $0x70] sm:$0xff]  ;;  %s1330_s5 = scalar_lea.hbm %s1381_s3, %s764_s29  ;;  %s983_s8 = sshll.u32 %s1060_s15, 4  ;;  %s984_s8 = int_to_ptr.vmem [resolvable:$false] %s983_s8 }
  0x23   : > { %874 = vmatprep.subr.bf16.mxu0 %v873_v37  ;;  %898 = vmatprep.subr.bf16.mxu1 %v897_v59  ;;  %v909_v22 = vpack.c.bf16 %v469_v21, %v468_v20  ;;  %s985_s9 = scalar_lea.vmem %s984_s8, 512  ;;  %p986_p1 = scmp.lt.s32.totalorder %s1325_s28, %s984_s8 }
  0x24   : > { %p987_p2 = scmp.lt.s32.totalorder %s985_s9, %s979_s7 }
  0x26   : > { %876 = vmatpush1.bf16.msra.mxu0 %v875_v46  ;;  %900 = vmatpush3.bf16.msra.mxu1 %v897_v59  ;;  %p988_p3 = por %p987_p2, %p986_p1 }
  0x27   : > { %878 = vmatprep.subr.bf16.mxu0 %v877_v47  ;;  %902 = vmatprep.subr.bf16.mxu1 %v901_v63 }
  0x28   : > { %p989_p5 = pnand %p988_p3, %p982_p0 }
  0x2a   : > { %880 = vmatpush1.bf16.msra.mxu0 %v879_v55  ;;  %904 = vmatpush3.bf16.msra.mxu1 %v901_v63 }
  0x2b   : > { %882 = vmatprep.subr.bf16.mxu0 %v881_v56  ;;  %906 = vmatprep.subr.bf16.mxu1 %v905_v3 }
  0x2e   : > { %884 = vmatpush1.bf16.msra.mxu0 %v883_v62  ;;  %908 = vmatpush3.bf16.msra.mxu1 %v905_v3 }
  0x2f   : > { %910 = vmatprep.subr.bf16.mxu1 %v909_v22 }
  0x31   : > { %312 = vmatmul.mubr.f32.vlgmr.msra.gmra.mrb[0].mxu0 %v199_v2 }
  0x32   : > { %317 = vmatprep.mubr.f32.mxu0 %v1059_v7  ;;  %912 = vmatpush3.bf16.msra.mxu1 %v909_v22 }
  0x35   : > { %318 = vmatmul.mubr.f32.gmra.mrb[2].mxu0 %v200_v4 }
  0x36   : > { %323 = vmatprep.mubr.f32.mxu0 %v1059_v7 }
  0x39   : > { %324 = vmatmul.mubr.f32.gmra.mrb[4].mxu0 %v201_v5 }
  0x3a   : > { %329 = vmatprep.mubr.f32.mxu0 %v1059_v7 }
  0x3d   : > { %330 = vmatmul.mubr.f32.gmra.mrb[6].mxu0 %v202_v6 }
  0x3e   : > { %335 = vmatprep.mubr.f32.mxu0 %v1059_v7 }
  0x41   : > { %336 = vmatmul.mubr.f32.gmra.mrb[8].mxu0 %v203_v8 }
  0x42   : > { %341 = vmatprep.mubr.f32.mxu0 %v1059_v7 }
  0x45   : > { %342 = vmatmul.mubr.f32.gmra.mrb[10].mxu0 %v204_v9 }
  0x46   : > { %347 = vmatprep.mubr.f32.mxu0 %v1059_v7 }
  0x49   : > { %348 = vmatmul.mubr.f32.gmra.mrb[12].mxu0 %v205_v10 }
  0x4a   : > { %353 = vmatprep.mubr.f32.mxu0 %v1059_v7 }
  0x4d   : > { %354 = vmatmul.mubr.f32.gmra.mrb[14].mxu0 %v206_v11 }
  0x4e   : > { %359 = vmatprep.mubr.f32.mxu0 %v1059_v7 }
  0x51   : > { %360 = vmatmul.mubr.f32.gmra.mrb[16].mxu0 %v207_v12 }
  0x52   : > { %365 = vmatprep.mubr.f32.mxu0 %v1059_v7 }
  0x55   : > { %366 = vmatmul.mubr.f32.gmra.mrb[18].mxu0 %v208_v13 }
  0x56   : > { %371 = vmatprep.mubr.f32.mxu0 %v1059_v7 }
  0x59   : > { %372 = vmatmul.mubr.f32.gmra.mrb[20].mxu0 %v209_v14 }
  0x5a   : > { %377 = vmatprep.mubr.f32.mxu0 %v1059_v7 }
  0x5d   : > { %378 = vmatmul.mubr.f32.gmra.mrb[22].mxu0 %v210_v15 }
  0x5e   : > { %383 = vmatprep.mubr.f32.mxu0 %v1059_v7 }
  0x61   : > { %384 = vmatmul.mubr.f32.gmra.mrb[24].mxu0 %v211_v16 }
  0x62   : > { %389 = vmatprep.mubr.f32.mxu0 %v1059_v7 }
  0x65   : > { %390 = vmatmul.mubr.f32.gmra.mrb[26].mxu0 %v212_v17 }
  0x66   : > { %395 = vmatprep.mubr.f32.mxu0 %v1059_v7 }
  0x69   : > { %396 = vmatmul.mubr.f32.gmra.mrb[28].mxu0 %v213_v18 }
  0x6a   : > { %401 = vmatprep.mubr.f32.mxu0 %v1059_v7  ;;  %v471_v7 = vld [vmem:[%s1380_s2 + $0x78] sm:$0xff] }
  0x6b   : > { %v913_v24 = vpack.c.bf16 %v471_v7, %v470_v23 }
  0x6d   : > { %402 = vmatmul.mubr.f32.gmra.mrb[30].mxu0 %v214_v19  ;;  %914 = vmatprep.subr.bf16.mxu1 %v913_v24 }
  0x6e   : > { %916 = vmatpush3.bf16.msra.mxu1 %v913_v24 }
 0x104   : > { %v313_v25 = vpop.f32.mrb[0].mxu0 }
 0x105   : > { %v408_v26 = vmul.f32 %v313_v25, %v313_v25  ;;  %v315_v27 = vpop.f32.mrb[1].mxu0 }
 0x106   : > { %v424_v28 = vmul.f32 %v315_v27, %v315_v27 }
 0x108   : > { %v319_v29 = vpop.f32.mrb[2].mxu0  ;;  %v440_v30 = vadd.f32 %v424_v28, %v408_v26 }
 0x109   : > { %v409_v31 = vmul.f32 %v319_v29, %v319_v29  ;;  %v321_v32 = vpop.f32.mrb[3].mxu0 }
 0x10a   : > { %v425_v33 = vmul.f32 %v321_v32, %v321_v32  ;;  %829 = vmatprep.mubr.f32.mxu1 %v440_v30 }
 0x10c   : > { %v441_v34 = vadd.f32 %v425_v33, %v409_v31  ;;  %v325_v35 = vpop.f32.mrb[4].mxu0 }
 0x10d   : > { %v410_v36 = vmul.f32 %v325_v35, %v325_v35  ;;  %v327_v37 = vpop.f32.mrb[5].mxu0 }
 0x10e   : > { %v426_v38 = vmul.f32 %v327_v37, %v327_v37  ;;  %830 = vmatmul.mubr.f32.vlgmr.msra.gmra.mrb[0].mxu1 %v441_v34 }
 0x110   : > { %v442_v39 = vadd.f32 %v426_v38, %v410_v36  ;;  %v331_v40 = vpop.f32.mrb[6].mxu0 }
 0x111   : > { %v411_v41 = vmul.f32 %v331_v40, %v331_v40  ;;  %v333_v42 = vpop.f32.mrb[7].mxu0 }
 0x112   : > { %v427_v43 = vmul.f32 %v333_v42, %v333_v42  ;;  %832 = vmatprep.mubr.f32.mxu1 %v442_v39 }
 0x114   : > { %v443_v44 = vadd.f32 %v427_v43, %v411_v41  ;;  %v337_v45 = vpop.f32.mrb[8].mxu0 }
 0x115   : > { %v412_v46 = vmul.f32 %v337_v45, %v337_v45  ;;  %v339_v47 = vpop.f32.mrb[9].mxu0 }
 0x116   : > { %v428_v48 = vmul.f32 %v339_v47, %v339_v47  ;;  %833 = vmatmul.mubr.f32.gmra.mrb[2].mxu1 %v443_v44 }
 0x118   : > { %v444_v49 = vadd.f32 %v428_v48, %v412_v46  ;;  %v343_v50 = vpop.f32.mrb[10].mxu0 }
 0x119   : > { %v413_v51 = vmul.f32 %v343_v50, %v343_v50  ;;  %v345_v52 = vpop.f32.mrb[11].mxu0 }
 0x11a   : > { %v429_v53 = vmul.f32 %v345_v52, %v345_v52  ;;  %835 = vmatprep.mubr.f32.mxu1 %v444_v49 }
 0x11c   : > { %v445_v54 = vadd.f32 %v429_v53, %v413_v51  ;;  %v349_v55 = vpop.f32.mrb[12].mxu0 }
 0x11d   : > { %v414_v56 = vmul.f32 %v349_v55, %v349_v55  ;;  %v351_v57 = vpop.f32.mrb[13].mxu0 }
 0x11e   : > { %v430_v58 = vmul.f32 %v351_v57, %v351_v57  ;;  %836 = vmatmul.mubr.f32.gmra.mrb[4].mxu1 %v445_v54 }
 0x120   : > { %v446_v59 = vadd.f32 %v430_v58, %v414_v56  ;;  %v355_v60 = vpop.f32.mrb[14].mxu0 }
 0x121   : > { %v415_v61 = vmul.f32 %v355_v60, %v355_v60  ;;  %v357_v62 = vpop.f32.mrb[15].mxu0 }
 0x122   : > { %v431_v63 = vmul.f32 %v357_v62, %v357_v62  ;;  %838 = vmatprep.mubr.f32.mxu1 %v446_v59 }
 0x124   : > { %v447_v0 = vadd.f32 %v431_v63, %v415_v61  ;;  %v361_v1 = vpop.f32.mrb[16].mxu0 }
 0x125   : > { %v416_v2 = vmul.f32 %v361_v1, %v361_v1  ;;  %v363_v3 = vpop.f32.mrb[17].mxu0 }
 0x126   : > { %v432_v4 = vmul.f32 %v363_v3, %v363_v3  ;;  %839 = vmatmul.mubr.f32.gmra.mrb[6].mxu1 %v447_v0 }
 0x128   : > { %v448_v5 = vadd.f32 %v432_v4, %v416_v2  ;;  %v367_v6 = vpop.f32.mrb[18].mxu0 }
 0x129   : > { %v417_v8 = vmul.f32 %v367_v6, %v367_v6  ;;  %v369_v9 = vpop.f32.mrb[19].mxu0 }
 0x12a   : > { %v433_v10 = vmul.f32 %v369_v9, %v369_v9  ;;  %841 = vmatprep.mubr.f32.mxu1 %v448_v5 }
 0x12c   : > { %v449_v11 = vadd.f32 %v433_v10, %v417_v8  ;;  %v373_v12 = vpop.f32.mrb[20].mxu0 }
 0x12d   : > { %v418_v13 = vmul.f32 %v373_v12, %v373_v12  ;;  %v375_v14 = vpop.f32.mrb[21].mxu0 }
 0x12e   : > { %v434_v15 = vmul.f32 %v375_v14, %v375_v14  ;;  %842 = vmatmul.mubr.f32.gmra.mrb[8].mxu1 %v449_v11 }
 0x130   : > { %v450_v16 = vadd.f32 %v434_v15, %v418_v13  ;;  %v379_v17 = vpop.f32.mrb[22].mxu0 }
 0x131   : > { %v419_v18 = vmul.f32 %v379_v17, %v379_v17  ;;  %v381_v19 = vpop.f32.mrb[23].mxu0 }
 0x132   : > { %v435_v20 = vmul.f32 %v381_v19, %v381_v19  ;;  %844 = vmatprep.mubr.f32.mxu1 %v450_v16 }
 0x134   : > { %v451_v21 = vadd.f32 %v435_v20, %v419_v18  ;;  %v385_v22 = vpop.f32.mrb[24].mxu0 }
 0x135   : > { %v420_v23 = vmul.f32 %v385_v22, %v385_v22  ;;  %v387_v7 = vpop.f32.mrb[25].mxu0 }
 0x136   : > { %v436_v24 = vmul.f32 %v387_v7, %v387_v7  ;;  %845 = vmatmul.mubr.f32.gmra.mrb[10].mxu1 %v451_v21 }
 0x138   : > { %v452_v25 = vadd.f32 %v436_v24, %v420_v23  ;;  %v391_v26 = vpop.f32.mrb[26].mxu0 }
 0x139   : > { %v421_v27 = vmul.f32 %v391_v26, %v391_v26  ;;  %v393_v28 = vpop.f32.mrb[27].mxu0 }
 0x13a   : > { %v437_v29 = vmul.f32 %v393_v28, %v393_v28  ;;  %847 = vmatprep.mubr.f32.mxu1 %v452_v25 }
 0x13c   : > { %v453_v30 = vadd.f32 %v437_v29, %v421_v27  ;;  %v397_v31 = vpop.f32.mrb[28].mxu0 }
 0x13d   : > { %v422_v32 = vmul.f32 %v397_v31, %v397_v31  ;;  %v399_v33 = vpop.f32.mrb[29].mxu0 }
 0x13e   : > { %v438_v34 = vmul.f32 %v399_v33, %v399_v33  ;;  %848 = vmatmul.mubr.f32.gmra.mrb[12].mxu1 %v453_v30 }
 0x140   : > { %v454_v35 = vadd.f32 %v438_v34, %v422_v32  ;;  %v403_v36 = vpop.f32.mrb[30].mxu0 }
 0x141   : > { %v423_v37 = vmul.f32 %v403_v36, %v403_v36  ;;  %v405_v38 = vpop.f32.mrb[31].mxu0 }
 0x142   : > { %v439_v39 = vmul.f32 %v405_v38, %v405_v38  ;;  %850 = vmatprep.mubr.f32.mxu1 %v454_v35 }
 0x144   : > { %v455_v40 = vadd.f32 %v439_v39, %v423_v37 }
 0x146   : > { %851 = vmatmul.mubr.f32.gmra.mrb[14].mxu1 %v455_v40 }
 0x1e1   : > { %v831_v41 = vpop.f32.mrb[0].mxu1 }
 0x1e2   : > { %v538_v42 = vpop.f32.mrb[1].mxu1 }
 0x1e3   : > { %617 = vxpose.xlu0.b32.start [1/16] (narrow) %v538_v42, 16 }
 0x1e7   : > { %618 = vxpose.xlu0.b32.cont [2/16] (narrow) %v831_v41, 16 }
 0x1e9   : > { %v834_v43 = vpop.f32.mrb[2].mxu1 }
 0x1ea   : > { %v548_v44 = vpop.f32.mrb[3].mxu1 }
 0x1eb   : > { %619 = vxpose.xlu0.b32.cont [3/16] (narrow) %v548_v44, 16 }
 0x1ef   : > { %620 = vxpose.xlu0.b32.cont [4/16] (narrow) %v834_v43, 16 }
 0x1f1   : > { %v837_v45 = vpop.f32.mrb[4].mxu1 }
 0x1f2   : > { %v558_v46 = vpop.f32.mrb[5].mxu1 }
 0x1f3   : > { %621 = vxpose.xlu0.b32.cont [5/16] (narrow) %v558_v46, 16 }
 0x1f7   : > { %622 = vxpose.xlu0.b32.cont [6/16] (narrow) %v837_v45, 16 }
 0x1f9   : > { %v840_v47 = vpop.f32.mrb[6].mxu1 }
 0x1fa   : > { %v568_v48 = vpop.f32.mrb[7].mxu1 }
 0x1fb   : > { %623 = vxpose.xlu0.b32.cont [7/16] (narrow) %v568_v48, 16 }
 0x1ff   : > { %624 = vxpose.xlu0.b32.cont [8/16] (narrow) %v840_v47, 16 }
 0x201   : > { %v843_v49 = vpop.f32.mrb[8].mxu1 }
 0x202   : > { %v578_v50 = vpop.f32.mrb[9].mxu1 }
 0x203   : > { %625 = vxpose.xlu0.b32.cont [9/16] (narrow) %v578_v50, 16 }
 0x207   : > { %626 = vxpose.xlu0.b32.cont [10/16] (narrow) %v843_v49, 16 }
 0x209   : > { %v846_v51 = vpop.f32.mrb[10].mxu1 }
 0x20a   : > { %v588_v52 = vpop.f32.mrb[11].mxu1 }
 0x20b   : > { %627 = vxpose.xlu0.b32.cont [11/16] (narrow) %v588_v52, 16 }
 0x20f   : > { %628 = vxpose.xlu0.b32.cont [12/16] (narrow) %v846_v51, 16 }
 0x211   : > { %v849_v53 = vpop.f32.mrb[12].mxu1 }
 0x212   : > { %v598_v54 = vpop.f32.mrb[13].mxu1 }
 0x213   : > { %629 = vxpose.xlu0.b32.cont [13/16] (narrow) %v598_v54, 16 }
 0x217   : > { %630 = vxpose.xlu0.b32.cont [14/16] (narrow) %v849_v53, 16 }
 0x219   : > { %v852_v55 = vpop.f32.mrb[14].mxu1 }
 0x21a   : > { %v608_v56 = vpop.f32.mrb[15].mxu1 }
 0x21b   : > { %631 = vxpose.xlu0.b32.cont [15/16] (narrow) %v608_v56, 16 }
 0x21f   : > { %632 = vxpose.xlu0.b32.end [16/16] (narrow) %v852_v55, 16 }
 0x263   : > { %v633_v57 = vpop.trf.xlu0 }
 0x264   : > { %v649_v58 = vadd.f32 0.001, %v633_v57 }
 0x266   : > { %975 = vlog2.f32 %v649_v58 }
 0x267   : > { %v634_v59 = vpop.trf.xlu0 }
 0x268   : > { %v650_v60 = vadd.f32 0.001, %v634_v59 }
 0x26a   : > { %977 = vlog2.f32 %v650_v60 }
 0x270   : > { %v976_v61 = vpop.eup %975 }
 0x271   : > { %v652_v62 = vmul.f32 0.6931472, %v976_v61 }
 0x273   : > { %655 = vst [vmem:[%s188_s27] sm:$0xff] %v652_v62 }
 0x274   : > { %v978_v63 = vpop.eup %977 }
 0x275   : > { %v654_v0 = vmul.f32 0.6931472, %v978_v63 }
 0x277   : > { %656 = vst [vmem:[%s188_s27 + $0x8] sm:$0xff] %v654_v0 }
 0x278   : > { %992 = shalt.err (!%p989_p5)
}
 0x279   : > { %s993_s10 = scalar_lea.hbm %s1330_s5, 256  ;;  %s997_s19 = scalar_lea.hbm %s1381_s3, 512 }
 0x27a   : > { %p994_p6 = scmp.ne.s32.totalorder %s1330_s5, %s993_s10  ;;  %p998_p10 = scmp.lt.u32.totalorder %s1330_s5, %s1381_s3 }
 0x27b   : > { %p999_p11 = scmp.lt.u32.totalorder %s997_s19, %s993_s10  ;;  %p1001_p13 = scmp.lt.u32.totalorder %s993_s10, %s1330_s5 }
 0x27c   : > { %p995_p7 = pnand %p994_p6, %p1123_p4 }
 0x27d   : > { %p1000_p12 = por %p999_p11, %p998_p10 }
 0x27e   : > { %p996_p9 = pneg %p995_p7 }
 0x27f   : > { %p1002_p0 = por %p1001_p13, %p1000_p12 }
 0x281   : > { %p1003_p1 = pnand %p1002_p0, %p996_p9 }
 0x283   : > { %1006 = shalt.err (!%p1003_p1)
}
 0x284   : > { %s1061_s26 = smov 128   ;;  %s1062_s27 = smov 8  }
 0x285   : > { %917 = dma.vmem_to_hbm [thread:$0]  (%p1123_p4), %s1325_s28, 256, %s1330_s5, %s1332_s6, %s1061_s26, %s1061_s26, %s1062_s27  }
 0x286 PF: > { %p923_p2 = scmp.ge.s32.totalorder %s1057_s17, 2  ;;  %s687_s29 = sand.u32 1, %s1037_s12  }
 0x287   : > { %s688_s30 = scalar_lea.sflag [#allocation3], %s687_s29 }
 0x288   : > { %p920_p3 = pnand %p923_p2, %p1130_p8 }
 0x28a   : > { %1032 = dma.done.wait (!%p920_p3), %s688_s30, 256  }
 0x28b   : > { %1034 = vsyncadd (!%p920_p3), %s688_s30, 4294967040  ;;  %s16_s17 = sadd.s32 1, %s1057_s17   ;;  %s1384_s12 = smov %s1041_s13 }
 0x28c   : > { %p13_p5 = scmp.ge.s32.totalorder %s16_s17, 4   ;;  %s1385_s13 = smov %s1045_s14 }
 0x28d   : > { %s1386_s14 = smov %s1136_s25  ;;  %s1387_s15 = smov %s1053_s16 }
 0x28e   : > { %s1388_s16 = smov %s1390_s20  ;;  %15 = sbr.rel (!%p13_p5) target bundleno = 4 (0x4), region = 67 }
 0x295   :  { %693 = vsyncpa [#allocation3], 1 }
 0x296   :  { %695 = vsyncpa [#allocation3 + $0x1], 1 }

</bundles_post_ra>
